<compile_context>
chip_gen: v5e
topology: v5e:2x2
jax: 0.10.0
libtpu: 0.0.40
codegen_flags: <defaults>
</compile_context>

<pallas_src>
import functools

import jax
import jax.numpy as jnp
from jax.experimental import pallas as pl
from jax.experimental.pallas import tpu as pltpu


def _cdiv(a, b):
    return -(-a // b)


def _round_up(a, b):
    return _cdiv(a, b) * b


def _contrastive_loss_kernel(x1_ref, x2_ref, out_ref, acc_ref, *, margin, eps,
                             target, batch, dim, block_rows, block_cols,
                             mask_rows, mask_cols):
    i = pl.program_id(0)          # batch tile   ("parallel")
    j = pl.program_id(1)          # feature tile ("arbitrary", reduction, innermost)
    nj = pl.num_programs(1)

    @pl.when(j == 0)
    def _():
        acc_ref[...] = jnp.zeros_like(acc_ref)

    x1 = x1_ref[...].astype(jnp.float32)            # (TB, TD)
    x2 = x2_ref[...].astype(jnp.float32)            # (TB, TD)
    diff = x2 - x1

    if mask_rows or mask_cols:
        # Zero padded rows/cols *before* any nonlinearity so OOB garbage from
        # partial tiles can't leak through (NaN/Inf is killed by the select).
        ok = None
        if mask_rows:
            row = (jax.lax.broadcasted_iota(jnp.int32, (block_rows, block_cols), 0)
                   + i * block_rows)
            ok = row < batch
        if mask_cols:
            col = (jax.lax.broadcasted_iota(jnp.int32, (block_rows, block_cols), 1)
                   + j * block_cols)
            col_ok = col < dim
            ok = col_ok if ok is None else (ok & col_ok)
        diff = jnp.where(ok, diff, 0.0)

    # Squared L2 partial sums per row; lane-axis reduce lands on the XLU
    # (otherwise-idle slot here).
    acc_ref[...] += jnp.sum(diff * diff, axis=1, keepdims=True)   # (TB, 1)

    @pl.when(j == nj - 1)
    def _():
        distances = acc_ref[...]                                   # (TB, 1)

        # `target` is a trace-time Python constant -> specialize the body.
        if target == 1.0:
            losses = 0.5 * distances
        elif target == 0.0:
            hinge = jnp.maximum(margin - jnp.sqrt(distances + eps), 0.0)
            losses = 0.5 * hinge * hinge
        else:
            hinge = jnp.maximum(margin - jnp.sqrt(distances + eps), 0.0)
            losses = 0.5 * (target * distances + (1.0 - target) * hinge * hinge)

        if mask_rows:
            # hinge(0) != 0 for target != 1, so masked rows must be zeroed here too.
            row = (jax.lax.broadcasted_iota(jnp.int32, (block_rows, 1), 0)
                   + i * block_rows)
            losses = jnp.where(row < batch, losses, 0.0)

        partial = jnp.sum(losses)                                  # f32 scalar
        # Lane/sublane-dense unmasked store of the per-tile partial sum.
        out_ref[...] = jnp.full(out_ref.shape, partial, dtype=jnp.float32)


def _vmem_limit_bytes():
    """Generation-aware scoped-VMEM limit (~3/4 of physical, <= 96 MiB)."""
    try:
        vmem_capacity = int(pltpu.get_tpu_info().vmem_capacity_bytes)
    except Exception:
        # v7x has the smallest physical VMEM per TensorCore (64 MiB); this
        # fallback is therefore safe on every generation.
        vmem_capacity = 64 * 1024 * 1024
    return min(vmem_capacity * 3 // 4, 96 * 1024 * 1024)


def _auto_tiling(batch, dim, itemsize, sublane, vmem_limit):
    """Pick (block_rows, block_cols) filling ~60% of the VMEM limit."""
    tile_budget = int(vmem_limit * 0.6)
    # Bytes resident in VMEM per (row, col) element at steady state:
    #   2 inputs x 2 pipeline buffers x itemsize   (streamed blocks)
    # + ~3 f32 copies (x1/x2 upcasts, diff, diff^2) Mosaic may materialize.
    bytes_per_elem = 4 * itemsize + 3 * 4

    cap_rows = (tile_budget // (bytes_per_elem * dim)) // sublane * sublane

    if cap_rows >= sublane:
        block_cols = dim
        if batch <= cap_rows:
            if batch > 2 * sublane:
                # Split into (at least) 2 batch tiles so the "parallel" axis
                # has work for both v7x TensorCores; harmless elsewhere.
                block_rows = _round_up(_cdiv(batch, 2), sublane)
            else:
                block_rows = batch
        else:
            block_rows = cap_rows
    else:
        # Very wide feature dim: tile D too (second, "arbitrary" grid axis with
        # an f32 accumulator), keeping the kernel at roofline for huge D.
        block_rows = batch if batch <= sublane else sublane
        cap_cols = tile_budget // (bytes_per_elem * max(block_rows, sublane))
        block_cols = max(128, (cap_cols // 128) * 128)
        block_cols = min(block_cols, _round_up(dim, 128))
    return block_rows, block_cols


def contrastive_loss(output1, output2, target=1.0, size_average=True,
                     margin=0.1, eps=1e-9, block_rows=None, block_cols=None,
                     buffer_count=None):
    assert output1.shape == output2.shape and output1.ndim == 2
    batch, dim = output1.shape
    itemsize = jnp.dtype(output1.dtype).itemsize
    sublane = 16 if itemsize == 2 else 8            # bf16 packs 16 sublanes

    vmem_limit = _vmem_limit_bytes()
    auto_rows, auto_cols = _auto_tiling(batch, dim, itemsize, sublane, vmem_limit)

    # User overrides are validated/rounded so they satisfy the (8, 128)
    # BlockSpec divisibility rule.
    if block_rows is None:
        block_rows = auto_rows
    else:
        block_rows = batch if block_rows >= batch else _round_up(block_rows, sublane)
    if block_cols is None:
        block_cols = auto_cols
    else:
        block_cols = dim if block_cols >= dim else _round_up(block_cols, 128)

    num_row_tiles = _cdiv(batch, block_rows)
    num_d_tiles = _cdiv(dim, block_cols)
    mask_rows = (batch % block_rows) != 0
    mask_cols = (dim % block_cols) != 0

    kernel = functools.partial(
        _contrastive_loss_kernel,
        margin=float(margin),
        eps=float(eps),
        target=float(target),   # must be a trace-time constant (see TODO above)
        batch=batch,
        dim=dim,
        block_rows=block_rows,
        block_cols=block_cols,
        mask_rows=mask_rows,
        mask_cols=mask_cols,
    )

    in_block = (block_rows, block_cols)
    if buffer_count is not None and buffer_count != 2:
        # Optional measured sweep knob (P: Buffered(3)); not the default.
        in_specs = [
            pl.BlockSpec(in_block, lambda i, j: (i, j),
                         pipeline_mode=pl.Buffered(buffer_count)),
            pl.BlockSpec(in_block, lambda i, j: (i, j),
                         pipeline_mode=pl.Buffered(buffer_count)),
        ]
    else:
        in_specs = [
            pl.BlockSpec(in_block, lambda i, j: (i, j)),
            pl.BlockSpec(in_block, lambda i, j: (i, j)),
        ]

    partials = pl.pallas_call(
        kernel,
        out_shape=jax.ShapeDtypeStruct((num_row_tiles, 8, 128), jnp.float32),
        grid_spec=pltpu.PrefetchScalarGridSpec(
            num_scalar_prefetch=0,
            grid=(num_row_tiles, num_d_tiles),
            in_specs=in_specs,
            out_specs=pl.BlockSpec((1, 8, 128), lambda i, j: (i, 0, 0)),
            scratch_shapes=[pltpu.VMEM((block_rows, 1), jnp.float32)],
        ),
        compiler_params=pltpu.CompilerParams(
            dimension_semantics=("parallel", "arbitrary"),
            vmem_limit_bytes=int(vmem_limit)),
    )(output1, output2)

    total = jnp.sum(partials[:, 0, 0])
    return total / batch if size_average else total


def _reference(output1, output2, target=1.0, size_average=True,
               margin=0.1, eps=1e-9):
    o1 = output1.astype(jnp.float32)
    o2 = output2.astype(jnp.float32)
    d = jnp.sum((o2 - o1) ** 2, axis=1)
    losses = 0.5 * (target * d
                    + (1.0 - target)
                    * jnp.maximum(margin - jnp.sqrt(d + eps), 0.0) ** 2)
    return jnp.mean(losses) if size_average else jnp.sum(losses)


if __name__ == "__main__":
    key = jax.random.PRNGKey(0)
    k1, k2, k3, k4, k5, k6 = jax.random.split(key, 6)

    B, D = 8, 32
    out1 = jax.random.normal(k1, (B, D), dtype=jnp.float32)
    out2 = jax.random.normal(k2, (B, D), dtype=jnp.float32)

    # target == 1 branch (default), mean reduction
    got = contrastive_loss(out1, out2, target=1.0, size_average=True)
    jax.block_until_ready(got)
    ref = _reference(out1, out2, target=1.0, size_average=True)
    assert jnp.allclose(got, ref, rtol=1e-5, atol=1e-6)

    # target == 0 branch (margin / sqrt / relu path), sum reduction
    got = contrastive_loss(out1, out2, target=0.0, size_average=False)
    ref = _reference(out1, out2, target=0.0, size_average=False)
    assert jnp.allclose(got, ref, rtol=1e-5, atol=1e-6)

    # fractional target (general path)
    got = contrastive_loss(out1, out2, target=0.5, size_average=True)
    ref = _reference(out1, out2, target=0.5, size_average=True)
    assert jnp.allclose(got, ref, rtol=1e-5, atol=1e-6)

    # batch tiling with a masked partial last tile: B=12, TB=8 -> 2 tiles
    B2 = 12
    out1b = jax.random.normal(k3, (B2, D), dtype=jnp.float32)
    out2b = jax.random.normal(k4, (B2, D), dtype=jnp.float32)
    got = contrastive_loss(out1b, out2b, target=0.0, size_average=True,
                           block_rows=8)
    ref = _reference(out1b, out2b, target=0.0, size_average=True)
    assert jnp.allclose(got, ref, rtol=1e-5, atol=1e-6)

    # feature-dim tiling path (reduction over a second, "arbitrary" grid axis)
    B3, D3 = 16, 256
    out1c = jax.random.normal(k5, (B3, D3), dtype=jnp.float32)
    out2c = jax.random.normal(k6, (B3, D3), dtype=jnp.float32)
    got = contrastive_loss(out1c, out2c, target=0.0, size_average=True,
                           block_cols=128)
    ref = _reference(out1c, out2c, target=0.0, size_average=True)
    assert jnp.allclose(got, ref, rtol=1e-5, atol=1e-6)

    # feature-dim tiling with a masked partial last D tile (D=200, TD=128)
    got = contrastive_loss(out1c[:, :200], out2c[:, :200], target=0.5,
                           size_average=False, block_cols=128)
    ref = _reference(out1c[:, :200], out2c[:, :200], target=0.5,
                     size_average=False)
    assert jnp.allclose(got, ref, rtol=1e-5, atol=1e-6)

    # bf16 streaming inputs (f32 accumulation in-kernel)
    got = contrastive_loss(out1.astype(jnp.bfloat16), out2.astype(jnp.bfloat16),
                           target=1.0, size_average=True)
    ref = _reference(out1.astype(jnp.bfloat16), out2.astype(jnp.bfloat16),
                     target=1.0, size_average=True)
    jax.block_until_ready(got)
    assert jnp.allclose(got, ref, rtol=2e-2, atol=2e-3)

    print("KERNEL_OK")
</pallas_src>

<mosaic_0001>
module attributes {stable_mosaic.version = 11 : i64} {
  func.func @_contrastive_loss_kernel(%arg0: i32, %arg1: i32, %arg2: memref<8x32xf32, #tpu.memory_space<vmem>>, %arg3: memref<8x32xf32, #tpu.memory_space<vmem>>, %arg4: memref<1x8x128xf32, #tpu.memory_space<vmem>>, %arg5: memref<8x1xf32, #tpu.memory_space<vmem>>) attributes {dimension_semantics = [#tpu.dimension_semantics<parallel>, #tpu.dimension_semantics<arbitrary>], iteration_bounds = array<i64: 1, 1>, scalar_prefetch = 0 : i64, scratch_operands = 1 : i64, tpu.core_type = #tpu.core_type<tc>, window_params = [{transform_indices = @transform_0, window_bounds = array<i64: 8, 32>}, {transform_indices = @transform_1, window_bounds = array<i64: 8, 32>}, {transform_indices = @transform_2, window_bounds = array<i64: 1, 8, 128>}]} {
    %c0_i32 = arith.constant 0 : i32
    %0 = arith.cmpi eq, %arg1, %c0_i32 : i32
    %1 = arith.extui %0 : i1 to i32
    %c0_i32_0 = arith.constant 0 : i32
    %2 = arith.cmpi ne, %1, %c0_i32_0 : i32
    scf.if %2 {
      %cst_10 = arith.constant 0.000000e+00 : f32
      %15 = vector.broadcast %cst_10 : f32 to vector<8x1xf32>
      %c0_11 = arith.constant 0 : index
      %c0_12 = arith.constant 0 : index
      %16 = vector.load %arg5[%c0_11, %c0_12] : memref<8x1xf32, #tpu.memory_space<vmem>>, vector<8x1xf32>
      tpu.vector_store %arg5[%c0_11, %c0_12], %15 {strides = array<i32>} : memref<8x1xf32, #tpu.memory_space<vmem>>, vector<8x1xf32>,
    } else {
    }
    %c0 = arith.constant 0 : index
    %c0_1 = arith.constant 0 : index
    %3 = vector.load %arg2[%c0, %c0_1] : memref<8x32xf32, #tpu.memory_space<vmem>>, vector<8x32xf32>
    %c0_2 = arith.constant 0 : index
    %c0_3 = arith.constant 0 : index
    %4 = vector.load %arg3[%c0_2, %c0_3] : memref<8x32xf32, #tpu.memory_space<vmem>>, vector<8x32xf32>
    %5 = arith.subf %4, %3 : vector<8x32xf32>
    %c0_4 = arith.constant 0 : index
    %c0_5 = arith.constant 0 : index
    %6 = vector.load %arg5[%c0_4, %c0_5] : memref<8x1xf32, #tpu.memory_space<vmem>>, vector<8x1xf32>
    %7 = arith.mulf %5, %5 : vector<8x32xf32>
    %cst = arith.constant dense<0.000000e+00> : vector<8xf32>
    %8 = vector.multi_reduction <add>, %7, %cst [1] : vector<8x32xf32> to vector<8xf32>
    %9 = vector.shape_cast %8 : vector<8xf32> to vector<8x1xf32>
    %10 = arith.addf %6, %9 : vector<8x1xf32>
    %c0_6 = arith.constant 0 : index
    %c0_7 = arith.constant 0 : index
    %11 = vector.load %arg5[%c0_6, %c0_7] : memref<8x1xf32, #tpu.memory_space<vmem>>, vector<8x1xf32>
    tpu.vector_store %arg5[%c0_6, %c0_7], %10 {strides = array<i32>} : memref<8x1xf32, #tpu.memory_space<vmem>>, vector<8x1xf32>,
    %c0_i32_8 = arith.constant 0 : i32
    %12 = arith.cmpi eq, %arg1, %c0_i32_8 : i32
    %13 = arith.extui %12 : i1 to i32
    %c0_i32_9 = arith.constant 0 : i32
    %14 = arith.cmpi ne, %13, %c0_i32_9 : i32
    scf.if %14 {
      %c0_10 = arith.constant 0 : index
      %c0_11 = arith.constant 0 : index
      %15 = vector.load %arg5[%c0_10, %c0_11] : memref<8x1xf32, #tpu.memory_space<vmem>>, vector<8x1xf32>
      %cst_12 = arith.constant 5.000000e-01 : f32
      %16 = vector.broadcast %cst_12 : f32 to vector<8x1xf32>
      %17 = arith.mulf %16, %15 : vector<8x1xf32>
      %18 = vector.shape_cast %17 : vector<8x1xf32> to vector<1x8x1xf32>
      %cst_13 = arith.constant dense<0.000000e+00> : vector<1xf32>
      %19 = vector.multi_reduction <add>, %18, %cst_13 [1, 2] : vector<1x8x1xf32> to vector<1xf32>
      %20 = vector.shape_cast %19 : vector<1xf32> to vector<1x1x1xf32>
      %21 = vector.extract %20[0, 0, 0] : f32 from vector<1x1x1xf32>
      %22 = vector.broadcast %21 : f32 to vector<1x8x128xf32>
      %c0_14 = arith.constant 0 : index
      %c0_15 = arith.constant 0 : index
      %c0_16 = arith.constant 0 : index
      %23 = vector.load %arg4[%c0_14, %c0_15, %c0_16] : memref<1x8x128xf32, #tpu.memory_space<vmem>>, vector<1x8x128xf32>
      tpu.vector_store %arg4[%c0_14, %c0_15, %c0_16], %22 {strides = array<i32>} : memref<1x8x128xf32, #tpu.memory_space<vmem>>, vector<1x8x128xf32>,
    } else {
    }
    return
  }
  func.func @transform_0(%arg0: i32, %arg1: i32) -> (i32, i32) {
    %c0_i32 = arith.constant 0 : i32
    return %arg0, %arg1 : i32, i32
  }
  func.func @transform_1(%arg0: i32, %arg1: i32) -> (i32, i32) {
    %c0_i32 = arith.constant 0 : i32
    return %arg0, %arg1 : i32, i32
  }
  func.func @transform_2(%arg0: i32, %arg1: i32) -> (i32, i32, i32) {
    %c0_i32 = arith.constant 0 : i32
    %c0_i32_0 = arith.constant 0 : i32
    %c0_i32_1 = arith.constant 0 : i32
    return %arg0, %c0_i32, %c0_i32_0 : i32, i32, i32
  }
}

</mosaic_0001>

<bundles_post_ra>
// kernel: tpu_custom_call.1
= control target key start
LH: loop header
LB: loop body
LE: loop exit
PB: predicated region body
PF: predicated region fallthrough
CT: control target
= control target key end

     0   :  { %7 = vsyncpa [#allocation4], 0  ;;  %s208_s0 = inlined_call_operand.hbm [shape: f32[8,32], index: 0, kind: input, shape index: {}]   ;;  %s209_s1 = inlined_call_operand.hbm [shape: f32[8,32], index: 1, kind: input, shape index: {}]   ;;  %s210_s2 = inlined_call_operand.hbm [shape: f32[1,8,128], index: 2, kind: output, shape index: {}]  }
   0x1   :  { %8 = vsyncpa [#allocation7], 0 }
   0x2   :  { %9 = vsyncpa [#allocation5], 0  ;;  %s15_s11 = sshll.u32 %s208_s0, 4  ;;  %s177_s12 = smov [#allocation3]   ;;  %s16_s11 = int_to_ptr.hbm [resolvable:$true] %s15_s11 }
   0x3   :  { %s17_s13 = sshll.u32 %s177_s12, 4  ;;  %s26_s16 = sshll.u32 %s209_s1, 4  ;;  %s18_s13 = int_to_ptr.vmem [resolvable:$true] %s17_s13  ;;  %s27_s16 = int_to_ptr.hbm [resolvable:$true] %s26_s16 }
   0x4   :  { %20 = dma.hbm_to_vmem [thread:$0]  %s16_s11, 128, %s18_s13, [#allocation4]  }
   0x5   :  { %s178_s17 = smov [#allocation6]  }
   0x6   :  { %s28_s18 = sshll.u32 %s178_s17, 4  ;;  %s29_s18 = int_to_ptr.vmem [resolvable:$true] %s28_s18 }
   0x7   :  { %31 = dma.hbm_to_vmem [thread:$0]  %s27_s16, 128, %s29_s18, [#allocation7]  }
   0x8   :  { %171 = dma.done.wait [#allocation4], 128  }
   0x9   :  { %172 = vsyncadd [#allocation4], 4294967168 }
   0xa   :  { %173 = dma.done.wait [#allocation7], 128  }
   0xb   :  { %174 = vsyncadd [#allocation7], 4294967168  ;;  %vm44_vm0 = vcmask 7168   ;;  %v179_v0 = vmov 0.0   ;;  %v46_v1 = vld [vmem:[#allocation3] sm:$0xff]  ;;  %v47_v2 = vld [vmem:[#allocation6] sm:$0xff] }
   0xc   :  { %45 = vst.msk [vmem:[#allocation2] sm:$0xff] %vm44_vm0, %v179_v0  ;;  %v48_v3 = vsub.f32 %v47_v2, %v46_v1  ;;  %vm51_vm1 = vcmask 261120   ;;  %s180_s0 = smov [#allocation8]   ;;  %s82_s21 = sshll.u32 %s210_s2, 4  ;;  %s83_s21 = int_to_ptr.hbm [resolvable:$true] %s82_s21 }
   0xd   :  { %s80_s1 = sshll.u32 %s180_s0, 4  ;;  %s81_s1 = int_to_ptr.vmem [resolvable:$true] %s80_s1 }
   0xe   :  { %v50_v4 = vmul.f32 %v48_v3, %v48_v3 }
  0x10   :  { %v52_v5 = vsel %vm51_vm1, %v50_v4, 0.0 }
  0x11   :  { %53 = vadd.xlane.f32.xlu0 %v52_v5 }
  0x13   :  { %v49_v6 = vld [vmem:[#allocation2] sm:$0xff] }
  0x84   :  { %v54_v7 = vpop.xlane.xlu0 %53 }
  0x85   :  { %v55_v8 = vadd.f32 %v54_v7, %v49_v6 }
  0x87   :  { %57 = vst.msk [vmem:[#allocation2] sm:$0xff] %vm44_vm0, %v55_v8 }
  0x8e   :  { %v61_v9 = vld [vmem:[#allocation2] sm:$0xff] }
  0x8f   :  { %v62_v10 = vmul.f32 0.5, %v61_v9 }
  0x91   :  { %v63_v11 = vsel %vm44_vm0, %v62_v10, 0.0 }
  0x92   :  { %64 = vadd.xlane.f32.xlu0 %v63_v11 }
 0x105   :  { %v65_v12 = vpop.xlane.xlu0 %64 }
 0x106   :  { %v66_v13 = vrot.slane %v65_v12, 4 }
 0x108   :  { %v67_v14 = vadd.f32 %v66_v13, %v65_v12 }
 0x10a   :  { %v68_v15 = vrot.slane %v67_v14, 2 }
 0x10c   :  { %v69_v16 = vadd.f32 %v68_v15, %v67_v14 }
 0x10e   :  { %v70_v17 = vrot.slane %v69_v16, 1 }
 0x110   :  { %v71_v18 = vadd.f32 %v70_v17, %v69_v16 }
 0x112   :  { %93 = vpush %v71_v18 }
 0x143   :  { %s94_s22 = spop %93 }
 0x144   :  { %v73_v19 = vstv %s94_s22 }
 0x145   :  { %74 = vst [vmem:[#allocation8] sm:$0xff] %v73_v19 }
 0x146   :  { %85 = dma.vmem_to_hbm [thread:$0]  %s81_s1, 128, %s83_s21, [#allocation5]  }
 0x147   :  { %175 = dma.done.wait [#allocation5], 128  }
 0x148   :  { %176 = vsyncadd [#allocation5], 4294967168 }
 0x149   :  { %90 = vsyncpa [#allocation4], 1 }
 0x14a   :  { %91 = vsyncpa [#allocation7], 1 }
 0x14b   :  { %92 = vsyncpa [#allocation5], 1 }

</bundles_post_ra>
